<compile_context>
chip_gen: v7x
topology: tpu7x:2x2x1
jax: 0.10.0
libtpu: 0.0.40
codegen_flags: <defaults>
</compile_context>

<pallas_src>
import functools

import jax
import jax.numpy as jnp
from jax.experimental import pallas as pl
from jax.experimental.pallas import tpu as pltpu

# ----------------------------- configuration (small, consistent with the module) ---------------
N_WRD_CELLS = 256      # module default 2048 (scaled down)
CSIZE       = 32       # module default 128 (scaled down)
CH          = 16       # module default 64 (scaled down)
VSIZE       = 7
VIEW_HW     = 16       # STRN view_size = (16, 16) (hard-coded in the module)
N_VIEW      = VIEW_HW * VIEW_HW
IMG         = 32       # input image H=W (encoder downsamples x2 -> 16x16)
HDIM        = 32       # generator recurrent hidden size
ZDIM        = 8        # latent size per DRAW step
L_STEPS     = 6        # generator L=6
DPOS        = 16       # STRN positional-embedding size
POSE9       = 9        # r_dim = csize + 9  -> 9-dim pose feature
RDIM        = CSIZE + POSE9


# =============================== generic dense (im2col matmul) kernel ===========================
def _dense_kernel(x_ref, w_ref, b_ref, o_ref, *, act):
    w = w_ref[...]
    x = x_ref[...].astype(w.dtype)                 # bf16 MXU operands when weight is bf16
    y = jnp.dot(x, w, preferred_element_type=jnp.float32) + b_ref[...]
    if act == "relu":
        y = jnp.maximum(y, 0.0)
    elif act == "tanh":
        y = jnp.tanh(y)
    o_ref[...] = y


def dense(x, w, b, act="none", block_m=256):
    """act(x @ w + b); tiled over M when possible so DMA pipelines and v7x can shard the grid."""
    M, K = x.shape
    N = w.shape[1]
    if M > block_m and M % block_m == 0:
        gm, bm = M // block_m, block_m
    else:
        gm, bm = 1, M
    return pl.pallas_call(
        functools.partial(_dense_kernel, act=act),
        out_shape=jax.ShapeDtypeStruct((M, N), jnp.float32),
        grid=(gm,),
        in_specs=[pl.BlockSpec((bm, K), lambda i: (i, 0)),
                  pl.BlockSpec((K, N), lambda i: (0, 0)),
                  pl.BlockSpec((1, N), lambda i: (0, 0))],
        out_specs=pl.BlockSpec((bm, N), lambda i: (i, 0)),
        compiler_params=pltpu.CompilerParams(dimension_semantics=("parallel",)),
    )(x, w, b)


# =============== fused observation routing + world-cell aggregation + scene fusion ==============
def _obs_fuse_kernel(fv_ref, vc_ref, wrd_ref, view_ref, o_ref):
    """One (scene, observation) step: route view cells -> world cells and accumulate the scene."""
    k = pl.program_id(1)

    @pl.when(k == 0)
    def _():
        o_ref[...] = jnp.zeros_like(o_ref)

    # logits[w, j] = wrd_pos[w] @ f(v) @ view_pos[j]   (bf16 MXU operands, f32 softmax)
    fv = fv_ref[0, 0].astype(jnp.bfloat16)                                    # (dpos, dpos)
    a = jnp.dot(wrd_ref[...], fv, preferred_element_type=jnp.float32)         # (n_wrd, dpos)
    logits = jax.lax.dot_general(a.astype(jnp.bfloat16), view_ref[...],
                                 (((1,), (1,)), ((), ())),
                                 preferred_element_type=jnp.float32)          # (n_wrd, n_view)
    logits = logits - jnp.max(logits, axis=1, keepdims=True)                  # softmax over view cells
    e = jnp.exp(logits)
    route = e * pl.reciprocal(jnp.sum(e, axis=1, keepdims=True), approx=True)

    # wrd_cell contribution = view_cell (csize, n_view) @ route^T -> (csize, n_wrd); stays in VMEM.
    wc = jax.lax.dot_general(vc_ref[0, 0].astype(jnp.bfloat16),
                             route.astype(jnp.bfloat16),
                             (((1,), (1,)), ((), ())),
                             preferred_element_type=jnp.float32)
    o_ref[0] += wc

    @pl.when(k == pl.num_programs(1) - 1)
    def _():
        o_ref[...] = jax.nn.sigmoid(o_ref[...])                               # step_scene_fusion


def observe_and_fuse(p, view_cell, v, n_obs):
    """step_observation_encode (routing + aggregation) + step_scene_fusion in one pallas_call."""
    B = v.shape[0]
    S = B // n_obs
    fv = dense(v, p["fv_w"], p["fv_b"], act="tanh").reshape(S, n_obs, DPOS, DPOS)
    vc = view_cell.reshape(S, n_obs, CSIZE, N_VIEW)
    return pl.pallas_call(
        _obs_fuse_kernel,
        out_shape=jax.ShapeDtypeStruct((S, CSIZE, N_WRD_CELLS), jnp.float32),
        grid=(S, n_obs),
        in_specs=[pl.BlockSpec((1, 1, DPOS, DPOS), lambda s, k: (s, k, 0, 0)),
                  pl.BlockSpec((1, 1, CSIZE, N_VIEW), lambda s, k: (s, k, 0, 0)),
                  pl.BlockSpec((N_WRD_CELLS, DPOS), lambda s, k: (0, 0)),
                  pl.BlockSpec((N_VIEW, DPOS), lambda s, k: (0, 0))],
        out_specs=pl.BlockSpec((1, CSIZE, N_WRD_CELLS), lambda s, k: (s, 0, 0)),
        compiler_params=pltpu.CompilerParams(dimension_semantics=("parallel", "arbitrary")),
    )(fv, vc, p["wrd_pos"], p["view_pos"])


# =============================== fused query routing + aggregation (strn.query) =================
def _query_fuse_kernel(fv_ref, scene_ref, wrd_ref, view_ref, o_ref):
    fv = fv_ref[0].astype(jnp.bfloat16)                                       # (dpos, dpos)
    a = jnp.dot(wrd_ref[...], fv, preferred_element_type=jnp.float32)         # (n_wrd, dpos)
    logits = jax.lax.dot_general(a.astype(jnp.bfloat16), view_ref[...],
                                 (((1,), (1,)), ((), ())),
                                 preferred_element_type=jnp.float32)          # (n_wrd, n_view)
    logits = logits - jnp.max(logits, axis=0, keepdims=True)                  # softmax over world cells
    e = jnp.exp(logits)
    route = e * pl.reciprocal(jnp.sum(e, axis=0, keepdims=True), approx=True)
    # view_cell_query = scene_cell (csize, n_wrd) @ route (n_wrd, n_view)
    o_ref[0] = jnp.dot(scene_ref[0].astype(jnp.bfloat16), route.astype(jnp.bfloat16),
                       preferred_element_type=jnp.float32)


def query_view(p, scene_cell, vq):
    S = scene_cell.shape[0]
    fv = dense(vq, p["fv_w"], p["fv_b"], act="tanh").reshape(S, DPOS, DPOS)
    return pl.pallas_call(
        _query_fuse_kernel,
        out_shape=jax.ShapeDtypeStruct((S, CSIZE, N_VIEW), jnp.float32),
        grid=(S,),
        in_specs=[pl.BlockSpec((1, DPOS, DPOS), lambda s: (s, 0, 0)),
                  pl.BlockSpec((1, CSIZE, N_WRD_CELLS), lambda s: (s, 0, 0)),
                  pl.BlockSpec((N_WRD_CELLS, DPOS), lambda s: (0, 0)),
                  pl.BlockSpec((N_VIEW, DPOS), lambda s: (0, 0))],
        out_specs=pl.BlockSpec((1, CSIZE, N_VIEW), lambda s: (s, 0, 0)),
        compiler_params=pltpu.CompilerParams(dimension_semantics=("parallel",)),
    )(fv, scene_cell, p["wrd_pos"], p["view_pos"])


# =============================== fused ConvDRAW generator kernel ================================
def _draw_kernel(eps_ref, xq_ref, r_ref,
                 wix_ref, wir_ref, wihg_ref, wihi_ref, bi_ref,
                 wgz_ref, wgr_ref, wghg_ref, bg_ref,
                 qw_ref, qb_ref, pw_ref, pb_ref,
                 uw_ref, ub_ref, dw_ref, db_ref,
                 dec_ref, kl_ref,
                 hg, cg, hi, ci, u_sc, ibase, gbase, klacc,
                 *, hdim, zdim):
    l = pl.program_id(0)

    # --- step 0: zero recurrent state and precompute the loop-invariant gate contributions ------
    @pl.when(l == 0)
    def _():
        xq = xq_ref[...].astype(jnp.bfloat16)
        r = r_ref[...].astype(jnp.bfloat16)
        ibase[...] = (jnp.dot(xq, wix_ref[...], preferred_element_type=jnp.float32)
                      + jnp.dot(r, wir_ref[...], preferred_element_type=jnp.float32)
                      + bi_ref[...])
        gbase[...] = jnp.dot(r, wgr_ref[...], preferred_element_type=jnp.float32) + bg_ref[...]
        hg[...] = jnp.zeros_like(hg)
        cg[...] = jnp.zeros_like(cg)
        hi[...] = jnp.zeros_like(hi)
        ci[...] = jnp.zeros_like(ci)
        u_sc[...] = jnp.zeros_like(u_sc)
        klacc[...] = jnp.zeros_like(klacc)

    hg_b = hg[...].astype(jnp.bfloat16)        # previous-step generator hidden (bf16 for MXU)
    hi_b = hi[...].astype(jnp.bfloat16)        # previous-step inference hidden

    # --- inference LSTM: gates([xq, r, h_g, h_i]) without materializing the concat --------------
    gates_i = (ibase[...]
               + jnp.dot(hg_b, wihg_ref[...], preferred_element_type=jnp.float32)
               + jnp.dot(hi_b, wihi_ref[...], preferred_element_type=jnp.float32))
    i_i = jax.nn.sigmoid(gates_i[:, 0 * hdim:1 * hdim])
    f_i = jax.nn.sigmoid(gates_i[:, 1 * hdim:2 * hdim])
    g_i = jnp.tanh(gates_i[:, 2 * hdim:3 * hdim])
    o_i = jax.nn.sigmoid(gates_i[:, 3 * hdim:4 * hdim])
    c_i_new = f_i * ci[...] + i_i * g_i
    h_i_new = o_i * jnp.tanh(c_i_new)
    ci[...] = c_i_new
    hi[...] = h_i_new

    # --- posterior / prior statistics ------------------------------------------------------------
    q_stats = jnp.dot(h_i_new.astype(jnp.bfloat16), qw_ref[...],
                      preferred_element_type=jnp.float32) + qb_ref[...]
    p_stats = jnp.dot(hg_b, pw_ref[...], preferred_element_type=jnp.float32) + pb_ref[...]
    mu_q, lv_q = q_stats[:, :zdim], q_stats[:, zdim:]
    mu_p, lv_p = p_stats[:, :zdim], p_stats[:, zdim:]

    z = mu_q + jnp.exp(0.5 * lv_q) * eps_ref[0]                   # reparameterized posterior sample

    # --- generator LSTM: gates([z, r, h_g]) ------------------------------------------------------
    gates_g = (gbase[...]
               + jnp.dot(z.astype(jnp.bfloat16), wgz_ref[...], preferred_element_type=jnp.float32)
               + jnp.dot(hg_b, wghg_ref[...], preferred_element_type=jnp.float32))
    i_g = jax.nn.sigmoid(gates_g[:, 0 * hdim:1 * hdim])
    f_g = jax.nn.sigmoid(gates_g[:, 1 * hdim:2 * hdim])
    g_g = jnp.tanh(gates_g[:, 2 * hdim:3 * hdim])
    o_g = jax.nn.sigmoid(gates_g[:, 3 * hdim:4 * hdim])
    c_g_new = f_g * cg[...] + i_g * g_g
    h_g_new = o_g * jnp.tanh(c_g_new)
    cg[...] = c_g_new
    hg[...] = h_g_new

    # --- canvas + KL accumulation (stay in VMEM) -------------------------------------------------
    u_sc[...] = u_sc[...] + jnp.dot(h_g_new.astype(jnp.bfloat16), uw_ref[...],
                                    preferred_element_type=jnp.float32) + ub_ref[...]
    klacc[...] = klacc[...] + 0.5 * (lv_p - lv_q +
                                     (jnp.exp(lv_q) + (mu_q - mu_p) ** 2) * jnp.exp(-lv_p) - 1.0)

    # --- last step: decode canvas and emit KL rows (single HBM store each) ------------------------
    @pl.when(l == pl.num_programs(0) - 1)
    def _():
        dec_ref[...] = jax.nn.sigmoid(
            jnp.dot(u_sc[...].astype(jnp.bfloat16), dw_ref[...],
                    preferred_element_type=jnp.float32) + db_ref[...])
        kl_ref[...] = klacc[...]


def generator_draw(p, xq_rows, r_rows, eps):
    """Entire L-step ConvDRAW loop in one pallas_call; all recurrent state lives in VMEM scratch."""
    M = xq_rows.shape[0]
    L = eps.shape[0]
    ins = [eps, xq_rows, r_rows,
           p["inf_wx"], p["inf_wr"], p["inf_whg"], p["inf_whi"], p["inf_b"],
           p["gen_wz"], p["gen_wr"], p["gen_whg"], p["gen_b"],
           p["q_w"], p["q_b"], p["p_w"], p["p_b"],
           p["u_w"], p["u_b"], p["dec_w"], p["dec_b"]]
    in_specs = ([pl.BlockSpec((1, M, ZDIM), lambda l: (l, 0, 0))]
                + [pl.BlockSpec(a.shape, lambda l: (0, 0)) for a in ins[1:]])
    dec, kl_rows = pl.pallas_call(
        functools.partial(_draw_kernel, hdim=HDIM, zdim=ZDIM),
        out_shape=(jax.ShapeDtypeStruct((M, 3 * 2 * 2), jnp.float32),
                   jax.ShapeDtypeStruct((M, ZDIM), jnp.float32)),
        grid=(L,),
        in_specs=in_specs,
        out_specs=(pl.BlockSpec((M, 3 * 2 * 2), lambda l: (0, 0)),
                   pl.BlockSpec((M, ZDIM), lambda l: (0, 0))),
        scratch_shapes=([pltpu.VMEM((M, HDIM), jnp.float32) for _ in range(5)]       # h_g,c_g,h_i,c_i,u
                        + [pltpu.VMEM((M, 4 * HDIM), jnp.float32) for _ in range(2)]  # inf_base, gen_base
                        + [pltpu.VMEM((M, ZDIM), jnp.float32)]),                      # kl accumulator
        compiler_params=pltpu.CompilerParams(dimension_semantics=("arbitrary",)),
    )(*ins)
    return dec, kl_rows


# =============================== JAX glue (reshapes / im2col / params) ==========================
def im2col(x_nhwc, k, stride, pad):
    xp = jnp.pad(x_nhwc, ((0, 0), (pad, pad), (pad, pad), (0, 0)))
    B, H, W, C = xp.shape
    oh = (H - k) // stride + 1
    ow = (W - k) // stride + 1
    cols = []
    for i in range(k):
        for j in range(k):
            cols.append(xp[:, i:i + stride * (oh - 1) + 1:stride,
                           j:j + stride * (ow - 1) + 1:stride, :])
    patches = jnp.concatenate(cols, axis=-1)            # (B, oh, ow, k*k*C)
    return patches.reshape(B * oh * ow, k * k * C), (B, oh, ow)


def init_params(key):
    ks = jax.random.split(key, 24)
    f32 = jnp.float32
    bf16 = jnp.bfloat16

    def f(k, shape, s=0.1, dtype=bf16):
        return (s * jax.random.normal(k, shape)).astype(dtype)

    p = {}
    # EncoderPose: conv(3x3,s2) -> concat pose -> conv(3x3,s1)   (MXU weights bf16, biases f32)
    p["enc_w1"] = f(ks[0], (3 * 3 * 3, CH));               p["enc_b1"] = jnp.zeros((1, CH), f32)
    p["enc_w2"] = f(ks[1], (3 * 3 * (CH + VSIZE), CSIZE)); p["enc_b2"] = jnp.zeros((1, CSIZE), f32)
    # STRN: pose -> (dpos x dpos) transform; fixed positional embeddings of world / view cells
    p["fv_w"] = f(ks[2], (VSIZE, DPOS * DPOS), dtype=f32); p["fv_b"] = jnp.zeros((1, DPOS * DPOS), f32)
    p["wrd_pos"] = f(ks[3], (N_WRD_CELLS, DPOS), 1.0)
    p["view_pos"] = f(ks[4], (N_VIEW, DPOS), 1.0)
    # pose -> 9-dim feature (r_dim = csize + 9)
    p["pose9_w"] = f(ks[5], (VSIZE, POSE9), dtype=f32);    p["pose9_b"] = jnp.zeros((1, POSE9), f32)
    # Generator (ConvDRAW-like, 1x1 convs over 16x16, shared across L steps).
    # inf gates act on [xq_enc, r, h_g, h_i]; gen gates act on [z, r, h_g] — stored pre-split
    # row-wise so the fused kernel never needs a concatenation.
    p["xq_w"] = f(ks[6], (3 * 3 * 3, HDIM));               p["xq_b"] = jnp.zeros((1, HDIM), f32)
    p["inf_wx"] = f(ks[7], (HDIM, 4 * HDIM))
    p["inf_wr"] = f(ks[8], (RDIM, 4 * HDIM))
    p["inf_whg"] = f(ks[9], (HDIM, 4 * HDIM))
    p["inf_whi"] = f(ks[10], (HDIM, 4 * HDIM));            p["inf_b"] = jnp.zeros((1, 4 * HDIM), f32)
    p["gen_wz"] = f(ks[11], (ZDIM, 4 * HDIM))
    p["gen_wr"] = f(ks[12], (RDIM, 4 * HDIM))
    p["gen_whg"] = f(ks[13], (HDIM, 4 * HDIM));            p["gen_b"] = jnp.zeros((1, 4 * HDIM), f32)
    p["q_w"] = f(ks[14], (HDIM, 2 * ZDIM));                p["q_b"] = jnp.zeros((1, 2 * ZDIM), f32)
    p["p_w"] = f(ks[15], (HDIM, 2 * ZDIM));                p["p_b"] = jnp.zeros((1, 2 * ZDIM), f32)
    p["u_w"] = f(ks[16], (HDIM, HDIM));                    p["u_b"] = jnp.zeros((1, HDIM), f32)
    p["dec_w"] = f(ks[17], (HDIM, 3 * 2 * 2));             p["dec_b"] = jnp.zeros((1, 3 * 2 * 2), f32)
    return p


# =============================== SRGQN forward ==================================================
def encoder_pose(p, x_nchw, v):
    """EncoderPose: (B,3,IMG,IMG), (B,7) -> view_cell (B, csize, 16*16)."""
    x = jnp.transpose(x_nchw, (0, 2, 3, 1))                       # NHWC
    cols1, (B, oh, ow) = im2col(x, 3, stride=2, pad=1)            # 32 -> 16
    h1 = dense(cols1, p["enc_w1"], p["enc_b1"], act="relu")       # (B*256, CH)
    h1 = h1.reshape(B, oh, ow, CH)
    vb = jnp.broadcast_to(v[:, None, None, :], (B, oh, ow, VSIZE))
    h1 = jnp.concatenate([h1, vb], axis=-1)                       # (B,16,16,CH+7)
    cols2, _ = im2col(h1, 3, stride=1, pad=1)
    h2 = dense(cols2, p["enc_w2"], p["enc_b2"], act="relu")       # (B*256, CSIZE)
    view_cell = jnp.transpose(h2.reshape(B, N_VIEW, CSIZE), (0, 2, 1))
    return view_cell                                              # (B, csize, 256)


def srgqn_forward(p, x, v, xq, vq, n_obs, eps):
    # --- step_observation_encode + step_scene_fusion (routing/aggregation/fusion fused) ---
    view_cell = encoder_pose(p, x, v)                             # (B, csize, 256)
    scene_cell = observe_and_fuse(p, view_cell, v, n_obs)         # (S, csize, n_wrd)

    # --- step_query_view: strn.query (route + aggregate fused per scene) ---
    S = scene_cell.shape[0]
    view_cell_query = query_view(p, scene_cell, vq)               # (S, csize, 256)

    # r = [view_cell_query, pose9]  as rows (S*256, csize+9)
    vq9 = dense(vq, p["pose9_w"], p["pose9_b"])                   # (S, 9)
    vcq_rows = jnp.transpose(view_cell_query, (0, 2, 1)).reshape(S * N_VIEW, CSIZE)
    vq9_rows = jnp.broadcast_to(vq9[:, None, :], (S, N_VIEW, POSE9)).reshape(S * N_VIEW, POSE9)
    r_rows = jnp.concatenate([vcq_rows, vq9_rows], axis=-1)       # (S*256, csize+9)

    # --- generator: encode xq then run the fused L-step ConvDRAW kernel ---
    xq_nhwc = jnp.transpose(xq, (0, 2, 3, 1))
    xq_cols, _ = im2col(xq_nhwc, 3, stride=2, pad=1)              # 32 -> 16
    xq_rows = dense(xq_cols, p["xq_w"], p["xq_b"], act="relu")    # (S*256, HDIM)

    dec, kl_rows = generator_draw(p, xq_rows, r_rows, eps)        # (M,12), (M,ZDIM)
    kl = jnp.sum(kl_rows.reshape(S, -1), axis=-1)                 # (S,)

    # decode canvas: per 16x16 cell -> 2x2x3 patch (depth-to-space to 32x32)
    dec = dec.reshape(S, VIEW_HW, VIEW_HW, 2, 2, 3)
    x_query = jnp.transpose(dec, (0, 5, 1, 3, 2, 4)).reshape(S, 3, IMG, IMG)
    return x_query, kl


# =============================== main ===========================================================
if __name__ == "__main__":
    key = jax.random.PRNGKey(0)
    k_par, k_x, k_v, k_xq, k_vq, k_eps = jax.random.split(key, 6)

    params = init_params(k_par)

    n_obs = 2          # scenes S = 1, observations per scene = 2
    B = 1 * n_obs
    x = jax.random.normal(k_x, (B, 3, IMG, IMG), jnp.float32)     # observation images (NCHW)
    v = jax.random.normal(k_v, (B, VSIZE), jnp.float32)           # observation poses
    xq = jax.random.normal(k_xq, (1, 3, IMG, IMG), jnp.float32)   # query image (NCHW)
    vq = jax.random.normal(k_vq, (1, VSIZE), jnp.float32)         # query pose
    eps = jax.random.normal(k_eps, (L_STEPS, 1 * N_VIEW, ZDIM), jnp.float32)

    x_query, kl = srgqn_forward(params, x, v, xq, vq, n_obs, eps)
    x_query = jax.block_until_ready(x_query)
    kl = jax.block_until_ready(kl)

    assert x_query.shape == (1, 3, IMG, IMG) and kl.shape == (1,)
    assert jnp.all(jnp.isfinite(x_query)) and jnp.all(jnp.isfinite(kl))
    print("KERNEL_OK")
</pallas_src>

<mosaic_0001>
module attributes {stable_mosaic.version = 11 : i64} {
  func.func @_dense_kernel(%arg0: i32, %arg1: memref<256x27xf32, #tpu.memory_space<vmem>>, %arg2: memref<27x16xbf16, #tpu.memory_space<vmem>>, %arg3: memref<1x16xf32, #tpu.memory_space<vmem>>, %arg4: memref<256x16xf32, #tpu.memory_space<vmem>>) attributes {dimension_semantics = [#tpu.dimension_semantics<parallel>], iteration_bounds = array<i64: 2>, scalar_prefetch = 0 : i64, scratch_operands = 0 : i64, tpu.core_type = #tpu.core_type<tc>, window_params = [{transform_indices = @transform_0, window_bounds = array<i64: 256, 27>}, {pipeline_mode = #tpu.pipeline_mode<synchronous>, transform_indices = @transform_1, window_bounds = array<i64: 27, 16>}, {pipeline_mode = #tpu.pipeline_mode<synchronous>, transform_indices = @transform_2, window_bounds = array<i64: 1, 16>}, {transform_indices = @transform_3, window_bounds = array<i64: 256, 16>}]} {
    %c0 = arith.constant 0 : index
    %c0_0 = arith.constant 0 : index
    %0 = vector.load %arg2[%c0, %c0_0] : memref<27x16xbf16, #tpu.memory_space<vmem>>, vector<27x16xbf16>
    %c0_1 = arith.constant 0 : index
    %c0_2 = arith.constant 0 : index
    %1 = vector.load %arg1[%c0_1, %c0_2] : memref<256x27xf32, #tpu.memory_space<vmem>>, vector<256x27xf32>
    %2 = arith.truncf %1 : vector<256x27xf32> to vector<256x27xbf16>
    %cst = arith.constant dense<0.000000e+00> : vector<256x16xf32>
    %3 = tpu.matmul %2, %0, %cst {dimension_numbers = #tpu.dot_dimension_numbers<[1], [0], [0], [1], [0, 0, 1, 1], [], []>} : vector<256x27xbf16>, vector<27x16xbf16>, vector<256x16xf32> -> vector<256x16xf32>
    %c0_3 = arith.constant 0 : index
    %c0_4 = arith.constant 0 : index
    %4 = vector.load %arg3[%c0_3, %c0_4] : memref<1x16xf32, #tpu.memory_space<vmem>>, vector<1x16xf32>
    %5 = vector.broadcast %4 : vector<1x16xf32> to vector<256x16xf32>
    %6 = arith.addf %3, %5 : vector<256x16xf32>
    %cst_5 = arith.constant 0.000000e+00 : f32
    %7 = vector.broadcast %cst_5 : f32 to vector<256x16xf32>
    %8 = arith.maximumf %6, %7 : vector<256x16xf32>
    %c0_6 = arith.constant 0 : index
    %c0_7 = arith.constant 0 : index
    %9 = vector.load %arg4[%c0_6, %c0_7] : memref<256x16xf32, #tpu.memory_space<vmem>>, vector<256x16xf32>
    tpu.vector_store %arg4[%c0_6, %c0_7], %8 {strides = array<i32>} : memref<256x16xf32, #tpu.memory_space<vmem>>, vector<256x16xf32>,
    return
  }
  func.func @transform_0(%arg0: i32) -> (i32, i32) {
    %c0_i32 = arith.constant 0 : i32
    %c0_i32_0 = arith.constant 0 : i32
    return %arg0, %c0_i32 : i32, i32
  }
  func.func @transform_1(%arg0: i32) -> (i32, i32) {
    %c0_i32 = arith.constant 0 : i32
    %c0_i32_0 = arith.constant 0 : i32
    %c0_i32_1 = arith.constant 0 : i32
    return %c0_i32, %c0_i32_0 : i32, i32
  }
  func.func @transform_2(%arg0: i32) -> (i32, i32) {
    %c0_i32 = arith.constant 0 : i32
    %c0_i32_0 = arith.constant 0 : i32
    %c0_i32_1 = arith.constant 0 : i32
    return %c0_i32, %c0_i32_0 : i32, i32
  }
  func.func @transform_3(%arg0: i32) -> (i32, i32) {
    %c0_i32 = arith.constant 0 : i32
    %c0_i32_0 = arith.constant 0 : i32
    return %arg0, %c0_i32 : i32, i32
  }
}

</mosaic_0001>

<bundles_post_ra>
// kernel: tpu_custom_call.1
= control target key start
LH: loop header
LB: loop body
LE: loop exit
PB: predicated region body
PF: predicated region fallthrough
CT: control target
= control target key end

     0   :  { %s711_s12 = smov 0   ;;  %s894_s0 = inlined_call_operand.vmem [shape: f32[512,27], index: 0, kind: input, shape index: {}]   ;;  %s895_s1 = inlined_call_operand.vmem [shape: bf16[27,16], index: 1, kind: input, shape index: {}]   ;;  %s896_s2 = inlined_call_operand.vmem [shape: f32[1,16], index: 2, kind: input, shape index: {}]   ;;  %s897_s3 = inlined_call_operand.vmem [shape: f32[512,16], index: 3, kind: output, shape index: {}]  }
   0x1 LB: > { %s583_s13 = sadd.s32 4294967295, %s688_s12   ;;  %p587_p0 = scmp.ge.s32.totalorder %s688_s12, 1  ;;  %s688_s12 = sphi %s711_s12, %s13_s12  }
   0x2   : > { %p138_p1 = scmp.lt.s32.totalorder %s688_s12, 3 }
   0x4   : > { %p139_p2 = pnand %p587_p0, %p138_p1 }
   0x5   : > { %v680_v0 = vld [vmem:[%s895_s1] sm:$0xff] (!%p139_p2)   ;;  %vm294_vm0 = vcmask (!%p139_p2), 1044480   ;;  %v681_v1 = vld [vmem:[%s895_s1 + $0x8] sm:$0x3f] (!%p139_p2)   ;;  %vm295_vm1 = vcmask (!%p139_p2), 1045504   ;;  %s588_s18 = sshll.u32 (!%p139_p2), %s583_s13, 5 }
   0x6   : > { %142 = sbr.rel (%p139_p2) target bundleno = 265 (0x109), region = 32  ;;  %631 = vmatprep.subr.bf16.mxu0 (!%p139_p2), %v680_v0  ;;  %667 = vmatprep.subr.bf16.mxu1 (!%p139_p2), %v680_v0  ;;  %v690_v2 = vmov (!%p139_p2), 65535   ;;  %p163_p3 = scmp.lt.s32.totalorder (!%p139_p2), %s588_s18, 63  ;;  %vm245_vm2 = vcmask (!%p139_p2), 220160   ;;  %v786_v54 = vld [vmem:[%s896_s2] ss:$0 sm:$0xff] (!%p139_p2) }
   0x7   : > { %632 = vmatpush3.bf16.msra.mxu0 (!%p139_p2), %v680_v0  ;;  %669 = vmatpush3.bf16.msra.mxu1 (!%p139_p2), %v680_v0  ;;  %v296_v3 = vsel (!%p139_p2), %vm294_vm0, 4294967295, %v690_v2  ;;  %vm494_vm3 = vcmask (!%p139_p2), 130048  }
   0x8   : > { %v297_v4 = vsel (!%p139_p2), %vm295_vm1, %v296_v3, 0 }
   0x9   : > { %v299_v5 = vand.u32 (!%p139_p2), %v681_v1, %v297_v4 }
   0xb   : > { %633 = vmatprep.subr.bf16.mxu0 (!%p139_p2), %v299_v5  ;;  %668 = vmatprep.subr.bf16.mxu1 (!%p139_p2), %v299_v5 }
   0xc   : > { %634 = vmatpush3.bf16.msra.mxu0 (!%p139_p2), %v299_v5  ;;  %670 = vmatpush3.bf16.msra.mxu1 (!%p139_p2), %v299_v5 }
   0xd   : > { %s899_s18 = smov (!%p163_p3, %s588_s18), 63 }
   0xe   : > { %s589_s19 = sshll.u32 %s899_s18, 3 }
   0xf   : > { %s733_s22 = scalar_lea.vmem %s894_s0, %s589_s19  ;;  %s794_s27 = scalar_lea.vmem %s897_s3, %s589_s19 }
  0x10   : > { %v179_v6 = vld [vmem:[%s733_s22] sm:$0xff]  ;;  %v180_v7 = vld [vmem:[%s733_s22 + $0x8] sm:$0xff]  ;;  %v181_v11 = vld [vmem:[%s733_s22 + $0x10] sm:$0xff] }
  0x11   : > { %v195_v8 = vld [vmem:[%s733_s22 + $0x80] sm:$0xff]  ;;  %v211_v9 = vpack.c.bf16 %v180_v7, %v179_v6  ;;  %v196_v10 = vld [vmem:[%s733_s22 + $0x88] sm:$0xff]  ;;  %v182_v12 = vld [vmem:[%s733_s22 + $0x18] sm:$0xff] }
  0x12   : > { %v219_v13 = vpack.c.bf16 %v196_v10, %v195_v8  ;;  %v212_v14 = vpack.c.bf16 %v182_v12, %v181_v11  ;;  %v197_v15 = vld [vmem:[%s733_s22 + $0x90] sm:$0xff]  ;;  %v198_v16 = vld [vmem:[%s733_s22 + $0x98] sm:$0xff]  ;;  %v183_v17 = vld [vmem:[%s733_s22 + $0x20] sm:$0xff] }
  0x13   : > { %635 = vmatprep.mubr.msk.bf16.mxu0 %vm245_vm2, %v211_v9  ;;  %v220_v18 = vpack.c.bf16 %v198_v16, %v197_v15  ;;  %v184_v19 = vld [vmem:[%s733_s22 + $0x28] sm:$0xff]  ;;  %v199_v20 = vld [vmem:[%s733_s22 + $0xa0] sm:$0xff]  ;;  %v185_v24 = vld [vmem:[%s733_s22 + $0x30] sm:$0xff] }
  0x14   : > { %v200_v21 = vld [vmem:[%s733_s22 + $0xa8] sm:$0xff]  ;;  %651 = vmatprep.mubr.msk.bf16.mxu1 %vm245_vm2, %v219_v13  ;;  %636 = vmatmul.mubr.msk.bf16.vlgmr.msra.gmra.mrb[0].mxu0 %vm245_vm2, %v212_v14  ;;  %v213_v22 = vpack.c.bf16 %v184_v19, %v183_v17  ;;  %v186_v25 = vld [vmem:[%s733_s22 + $0x38] sm:$0xff]  ;;  %v201_v26 = vld [vmem:[%s733_s22 + $0xb0] sm:$0xff] }
  0x15   : > { %v221_v23 = vpack.c.bf16 %v200_v21, %v199_v20  ;;  %652 = vmatmul.mubr.msk.bf16.vlgmr.msra.gmra.mrb[0].mxu1 %vm245_vm2, %v220_v18  ;;  %v202_v27 = vld [vmem:[%s733_s22 + $0xb8] sm:$0xff]  ;;  %v187_v28 = vld [vmem:[%s733_s22 + $0x40] sm:$0xff]  ;;  %v188_v29 = vld [vmem:[%s733_s22 + $0x48] sm:$0xff]  ;;  %v214_v32 = vpack.c.bf16 %v186_v25, %v185_v24 }
  0x16   : > { %639 = vmatprep.mubr.msk.bf16.mxu0 %vm245_vm2, %v213_v22  ;;  %v203_v30 = vld [vmem:[%s733_s22 + $0xc0] sm:$0xff]  ;;  %v204_v31 = vld [vmem:[%s733_s22 + $0xc8] sm:$0xff]  ;;  %v222_v33 = vpack.c.bf16 %v202_v27, %v201_v26  ;;  %v215_v34 = vpack.c.bf16 %v188_v29, %v187_v28  ;;  %v189_v36 = vld [vmem:[%s733_s22 + $0x50] sm:$0xff] }
  0x17   : > { %655 = vmatprep.mubr.msk.bf16.mxu1 %vm245_vm2, %v221_v23  ;;  %v223_v35 = vpack.c.bf16 %v204_v31, %v203_v30  ;;  %v190_v37 = vld [vmem:[%s733_s22 + $0x58] sm:$0xff]  ;;  %v205_v38 = vld [vmem:[%s733_s22 + $0xd0] sm:$0xff]  ;;  %v191_v40 = vld [vmem:[%s733_s22 + $0x60] sm:$0xff] }
  0x18   : > { %v206_v39 = vld [vmem:[%s733_s22 + $0xd8] sm:$0xff]  ;;  %v192_v41 = vld [vmem:[%s733_s22 + $0x68] sm:$0xff]  ;;  %v207_v42 = vld [vmem:[%s733_s22 + $0xe0] sm:$0xff]  ;;  %v216_v44 = vpack.c.bf16 %v190_v37, %v189_v36 }
  0x19   : > { %v208_v43 = vld [vmem:[%s733_s22 + $0xe8] sm:$0xff]  ;;  %v224_v45 = vpack.c.bf16 %v206_v39, %v205_v38  ;;  %v217_v46 = vpack.c.bf16 %v192_v41, %v191_v40  ;;  %v193_v48 = vld [vmem:[%s733_s22 + $0x70] sm:$0xff]  ;;  %v194_v49 = vld [vmem:[%s733_s22 + $0x78] sm:$0xff] }
  0x1a   : > { %v225_v47 = vpack.c.bf16 %v208_v43, %v207_v42  ;;  %v209_v50 = vld [vmem:[%s733_s22 + $0xf0] sm:$0xff]  ;;  %v210_v51 = vld [vmem:[%s733_s22 + $0xf8] sm:$0xff]  ;;  %v218_v52 = vpack.c.bf16 %v194_v49, %v193_v48 }
  0x1b   : > { %v226_v53 = vpack.c.bf16 %v210_v51, %v209_v50 }
  0x1c   : > { %640 = vmatmul.mubr.msk.bf16.gmra.mrb[4].mxu0 %vm245_vm2, %v214_v32 }
  0x1d   : > { %656 = vmatmul.mubr.msk.bf16.gmra.mrb[4].mxu1 %vm245_vm2, %v222_v33  ;;  %643 = vmatprep.mubr.msk.bf16.mxu0 %vm245_vm2, %v215_v34 }
  0x1e   : > { %659 = vmatprep.mubr.msk.bf16.mxu1 %vm245_vm2, %v223_v35 }
  0x24   : > { %644 = vmatmul.mubr.msk.bf16.gmra.mrb[8].mxu0 %vm245_vm2, %v216_v44 }
  0x25   : > { %660 = vmatmul.mubr.msk.bf16.gmra.mrb[8].mxu1 %vm245_vm2, %v224_v45  ;;  %647 = vmatprep.mubr.msk.bf16.mxu0 %vm245_vm2, %v217_v46 }
  0x26   : > { %663 = vmatprep.mubr.msk.bf16.mxu1 %vm245_vm2, %v225_v47 }
  0x2c   : > { %648 = vmatmul.mubr.msk.bf16.gmra.mrb[12].mxu0 %vm245_vm2, %v218_v52 }
  0x2d   : > { %664 = vmatmul.mubr.msk.bf16.gmra.mrb[12].mxu1 %vm245_vm2, %v226_v53 }
  0xe7   : > { %v637_v55 = vpop.f32.mrb[0].mxu0 }
  0xe8   : > { %v344_v56 = vadd.f32 %v637_v55, %v786_v54  ;;  %v653_v57 = vpop.f32.mrb[0].mxu1  ;;  %v335_v58 = vpop.f32.mrb[1].mxu0 }
  0xe9   : > { %v408_v59 = vadd.f32 %v653_v57, %v786_v54  ;;  %v336_v60 = vadd.f32 %v786_v54, %v335_v58  ;;  %v399_v61 = vpop.f32.mrb[1].mxu1  ;;  %v638_v62 = vpop.f32.mrb[2].mxu0 }
  0xea   : > { %v464_v63 = vmax.f32 %v344_v56, 0.0  ;;  %v400_v0 = vadd.f32 %v786_v54, %v399_v61  ;;  %v347_v1 = vadd.f32 %v638_v62, %v786_v54  ;;  %v654_v2 = vpop.f32.mrb[2].mxu1  ;;  %v338_v3 = vpop.f32.mrb[3].mxu0 }
  0xeb   : > { %v480_v4 = vmax.f32 %v408_v59, 0.0  ;;  %v462_v5 = vmax.f32 %v336_v60, 0.0  ;;  %v411_v6 = vadd.f32 %v654_v2, %v786_v54  ;;  %v339_v7 = vadd.f32 %v786_v54, %v338_v3  ;;  %v402_v8 = vpop.f32.mrb[3].mxu1 }
  0xec   : > { %497 = vst.msk [vmem:[%s794_s27 + $0x10] sm:$0xff] %vm494_vm3, %v464_v63  ;;  %v478_v9 = vmax.f32 %v400_v0, 0.0  ;;  %v465_v10 = vmax.f32 %v347_v1, 0.0  ;;  %v403_v11 = vadd.f32 %v786_v54, %v402_v8 }
  0xed   : > { %513 = vst.msk [vmem:[%s794_s27 + $0x90] sm:$0xff] %vm494_vm3, %v480_v4  ;;  %495 = vst.msk [vmem:[%s794_s27] sm:$0xff] %vm494_vm3, %v462_v5  ;;  %v481_v12 = vmax.f32 %v411_v6, 0.0  ;;  %v463_v13 = vmax.f32 %v339_v7, 0.0 }
  0xee   : > { %511 = vst.msk [vmem:[%s794_s27 + $0x80] sm:$0xff] %vm494_vm3, %v478_v9  ;;  %498 = vst.msk [vmem:[%s794_s27 + $0x18] sm:$0xff] %vm494_vm3, %v465_v10  ;;  %v479_v14 = vmax.f32 %v403_v11, 0.0 }
  0xef   : > { %514 = vst.msk [vmem:[%s794_s27 + $0x98] sm:$0xff] %vm494_vm3, %v481_v12  ;;  %496 = vst.msk [vmem:[%s794_s27 + $0x8] sm:$0xff] %vm494_vm3, %v463_v13  ;;  %v641_v15 = vpop.f32.mrb[4].mxu0 }
  0xf0   : > { %512 = vst.msk [vmem:[%s794_s27 + $0x88] sm:$0xff] %vm494_vm3, %v479_v14  ;;  %v360_v16 = vadd.f32 %v641_v15, %v786_v54  ;;  %v657_v17 = vpop.f32.mrb[4].mxu1  ;;  %v351_v18 = vpop.f32.mrb[5].mxu0 }
  0xf1   : > { %v424_v19 = vadd.f32 %v657_v17, %v786_v54  ;;  %v352_v20 = vadd.f32 %v786_v54, %v351_v18  ;;  %v415_v21 = vpop.f32.mrb[5].mxu1  ;;  %v642_v22 = vpop.f32.mrb[6].mxu0 }
  0xf2   : > { %v468_v23 = vmax.f32 %v360_v16, 0.0  ;;  %v416_v24 = vadd.f32 %v786_v54, %v415_v21  ;;  %v363_v25 = vadd.f32 %v642_v22, %v786_v54  ;;  %v658_v26 = vpop.f32.mrb[6].mxu1  ;;  %v354_v27 = vpop.f32.mrb[7].mxu0 }
  0xf3   : > { %v484_v28 = vmax.f32 %v424_v19, 0.0  ;;  %v466_v29 = vmax.f32 %v352_v20, 0.0  ;;  %v427_v30 = vadd.f32 %v658_v26, %v786_v54  ;;  %v355_v31 = vadd.f32 %v786_v54, %v354_v27  ;;  %v418_v32 = vpop.f32.mrb[7].mxu1 }
  0xf4   : > { %501 = vst.msk [vmem:[%s794_s27 + $0x30] sm:$0xff] %vm494_vm3, %v468_v23  ;;  %v482_v33 = vmax.f32 %v416_v24, 0.0  ;;  %v469_v34 = vmax.f32 %v363_v25, 0.0  ;;  %v419_v35 = vadd.f32 %v786_v54, %v418_v32 }
  0xf5   : > { %517 = vst.msk [vmem:[%s794_s27 + $0xb0] sm:$0xff] %vm494_vm3, %v484_v28  ;;  %499 = vst.msk [vmem:[%s794_s27 + $0x20] sm:$0xff] %vm494_vm3, %v466_v29  ;;  %v485_v36 = vmax.f32 %v427_v30, 0.0  ;;  %v467_v37 = vmax.f32 %v355_v31, 0.0 }
  0xf6   : > { %515 = vst.msk [vmem:[%s794_s27 + $0xa0] sm:$0xff] %vm494_vm3, %v482_v33  ;;  %502 = vst.msk [vmem:[%s794_s27 + $0x38] sm:$0xff] %vm494_vm3, %v469_v34  ;;  %v483_v38 = vmax.f32 %v419_v35, 0.0 }
  0xf7   : > { %518 = vst.msk [vmem:[%s794_s27 + $0xb8] sm:$0xff] %vm494_vm3, %v485_v36  ;;  %500 = vst.msk [vmem:[%s794_s27 + $0x28] sm:$0xff] %vm494_vm3, %v467_v37  ;;  %v645_v39 = vpop.f32.mrb[8].mxu0 }
  0xf8   : > { %516 = vst.msk [vmem:[%s794_s27 + $0xa8] sm:$0xff] %vm494_vm3, %v483_v38  ;;  %v376_v40 = vadd.f32 %v645_v39, %v786_v54  ;;  %v661_v41 = vpop.f32.mrb[8].mxu1  ;;  %v367_v42 = vpop.f32.mrb[9].mxu0 }
  0xf9   : > { %v440_v43 = vadd.f32 %v661_v41, %v786_v54  ;;  %v368_v44 = vadd.f32 %v786_v54, %v367_v42  ;;  %v431_v45 = vpop.f32.mrb[9].mxu1  ;;  %v646_v46 = vpop.f32.mrb[10].mxu0 }
  0xfa   : > { %v472_v47 = vmax.f32 %v376_v40, 0.0  ;;  %v432_v48 = vadd.f32 %v786_v54, %v431_v45  ;;  %v379_v49 = vadd.f32 %v646_v46, %v786_v54  ;;  %v662_v50 = vpop.f32.mrb[10].mxu1  ;;  %v370_v51 = vpop.f32.mrb[11].mxu0 }
  0xfb   : > { %v488_v52 = vmax.f32 %v440_v43, 0.0  ;;  %v470_v53 = vmax.f32 %v368_v44, 0.0  ;;  %v443_v55 = vadd.f32 %v662_v50, %v786_v54  ;;  %v371_v56 = vadd.f32 %v786_v54, %v370_v51  ;;  %v434_v57 = vpop.f32.mrb[11].mxu1 }
  0xfc   : > { %505 = vst.msk [vmem:[%s794_s27 + $0x50] sm:$0xff] %vm494_vm3, %v472_v47  ;;  %v486_v58 = vmax.f32 %v432_v48, 0.0  ;;  %v473_v59 = vmax.f32 %v379_v49, 0.0  ;;  %v435_v60 = vadd.f32 %v786_v54, %v434_v57 }
  0xfd   : > { %521 = vst.msk [vmem:[%s794_s27 + $0xd0] sm:$0xff] %vm494_vm3, %v488_v52  ;;  %503 = vst.msk [vmem:[%s794_s27 + $0x40] sm:$0xff] %vm494_vm3, %v470_v53  ;;  %v489_v61 = vmax.f32 %v443_v55, 0.0  ;;  %v471_v62 = vmax.f32 %v371_v56, 0.0 }
  0xfe   : > { %519 = vst.msk [vmem:[%s794_s27 + $0xc0] sm:$0xff] %vm494_vm3, %v486_v58  ;;  %506 = vst.msk [vmem:[%s794_s27 + $0x58] sm:$0xff] %vm494_vm3, %v473_v59  ;;  %v487_v63 = vmax.f32 %v435_v60, 0.0 }
  0xff   : > { %522 = vst.msk [vmem:[%s794_s27 + $0xd8] sm:$0xff] %vm494_vm3, %v489_v61  ;;  %504 = vst.msk [vmem:[%s794_s27 + $0x48] sm:$0xff] %vm494_vm3, %v471_v62  ;;  %v649_v0 = vpop.f32.mrb[12].mxu0 }
 0x100   : > { %520 = vst.msk [vmem:[%s794_s27 + $0xc8] sm:$0xff] %vm494_vm3, %v487_v63  ;;  %v392_v1 = vadd.f32 %v649_v0, %v786_v54  ;;  %v665_v2 = vpop.f32.mrb[12].mxu1  ;;  %v383_v3 = vpop.f32.mrb[13].mxu0 }
 0x101   : > { %v456_v4 = vadd.f32 %v665_v2, %v786_v54  ;;  %v384_v5 = vadd.f32 %v786_v54, %v383_v3  ;;  %v447_v6 = vpop.f32.mrb[13].mxu1  ;;  %v650_v7 = vpop.f32.mrb[14].mxu0 }
 0x102   : > { %v476_v8 = vmax.f32 %v392_v1, 0.0  ;;  %v448_v9 = vadd.f32 %v786_v54, %v447_v6  ;;  %v395_v10 = vadd.f32 %v650_v7, %v786_v54  ;;  %v666_v11 = vpop.f32.mrb[14].mxu1  ;;  %v386_v12 = vpop.f32.mrb[15].mxu0 }
 0x103   : > { %v492_v13 = vmax.f32 %v456_v4, 0.0  ;;  %v474_v14 = vmax.f32 %v384_v5, 0.0  ;;  %v459_v15 = vadd.f32 %v666_v11, %v786_v54  ;;  %v387_v16 = vadd.f32 %v786_v54, %v386_v12  ;;  %v450_v17 = vpop.f32.mrb[15].mxu1 }
 0x104   : > { %509 = vst.msk [vmem:[%s794_s27 + $0x70] sm:$0xff] %vm494_vm3, %v476_v8  ;;  %v490_v18 = vmax.f32 %v448_v9, 0.0  ;;  %v477_v19 = vmax.f32 %v395_v10, 0.0  ;;  %v451_v20 = vadd.f32 %v786_v54, %v450_v17 }
 0x105   : > { %525 = vst.msk [vmem:[%s794_s27 + $0xf0] sm:$0xff] %vm494_vm3, %v492_v13  ;;  %507 = vst.msk [vmem:[%s794_s27 + $0x60] sm:$0xff] %vm494_vm3, %v474_v14  ;;  %v493_v21 = vmax.f32 %v459_v15, 0.0  ;;  %v475_v22 = vmax.f32 %v387_v16, 0.0 }
 0x106   : > { %523 = vst.msk [vmem:[%s794_s27 + $0xe0] sm:$0xff] %vm494_vm3, %v490_v18  ;;  %510 = vst.msk [vmem:[%s794_s27 + $0x78] sm:$0xff] %vm494_vm3, %v477_v19  ;;  %v491_v23 = vmax.f32 %v451_v20, 0.0 }
 0x107   : > { %526 = vst.msk [vmem:[%s794_s27 + $0xf8] sm:$0xff] %vm494_vm3, %v493_v21  ;;  %508 = vst.msk [vmem:[%s794_s27 + $0x68] sm:$0xff] %vm494_vm3, %v475_v22 }
 0x108   : > { %524 = vst.msk [vmem:[%s794_s27 + $0xe8] sm:$0xff] %vm494_vm3, %v491_v23 }
 0x109 PF: > { %s13_s12 = sadd.s32 1, %s688_s12  }
 0x10a   : > { %p10_p4 = scmp.ge.s32.totalorder %s13_s12, 4  }
 0x10c   :  { %12 = sbr.rel (!%p10_p4) target bundleno = 1 (0x1), region = 62 }

</bundles_post_ra>
